<compile_context>
chip_gen: v6e
topology: v6e:2x2x1
jax: 0.10.0
libtpu: 0.0.40
codegen_flags: <defaults>
</compile_context>

<pallas_src>
import functools

import jax
import jax.numpy as jnp
from jax import lax
from jax.experimental import pallas as pl
from jax.experimental.pallas import tpu as pltpu

LANE = 128        # lane width -> padded embedding dim
TILE_U_MAX = 256  # user rows per MXU tile (perf review: 8 -> 256)
TILE_E_MAX = 512  # entity columns (reduction axis) per tile (128 -> 512)
TILE_ROWS = 32    # destination-entity rows per kernel-1 grid step


def _round_up(x, m):
    return ((x + m - 1) // m) * m


# ----------------------------------------------------------------------------
# Kernel 1: KG aggregation (CSR segment-sum) + normalize + residual (fused)
#   neigh      = entity_emb[tail] * relation_emb[edge_type]
#   entity_agg = scatter_sum(neigh, index=head)        (== scatter_mean up to
#                                                        a positive row scale)
#   entity_new = l2_normalize(entity_agg, dim=1)
#   res_new    = entity_res + entity_new
#   ent_bf16   = entity_new.astype(bf16)               (feeds kernel 2 next hop)
# row_ptr/tail/etype are scalar-prefetched (SMEM); the grid is parallel over
# destination-row tiles; each row is accumulated in vregs and stored once.
# ----------------------------------------------------------------------------
def kg_aggregate_kernel(row_ptr_ref, tail_ref, etype_ref,          # SMEM
                        entity_ref, relation_ref, res_ref,         # VMEM in
                        ent_new_ref, ent_bf16_ref, res_new_ref,    # outputs
                        *, tile_rows):
    base = pl.program_id(0) * tile_rows
    d = entity_ref.shape[1]

    def row_body(r, carry):
        lo = row_ptr_ref[base + r]
        hi = row_ptr_ref[base + r + 1]

        def edge_body(e, acc):
            tl = tail_ref[e]
            rt = etype_ref[e]
            return acc + (entity_ref[pl.ds(tl, 1), :] *
                          relation_ref[pl.ds(rt, 1), :])

        acc = lax.fori_loop(lo, hi, edge_body, jnp.zeros((1, d), jnp.float32))
        ent_new_ref[pl.ds(r, 1), :] = acc          # accumulate into output tile
        return carry

    lax.fori_loop(0, tile_rows, row_body, 0)

    # inv_deg dropped: L2-normalize removes any positive per-row scale, so
    # scatter_sum and scatter_mean yield the same normalized rows (eps aside).
    agg = ent_new_ref[...]
    ssq = jnp.sum(agg * agg, axis=1, keepdims=True)
    xn = agg * lax.rsqrt(ssq + 1e-24)               # F.normalize(dim=1)
    ent_new_ref[...] = xn
    ent_bf16_ref[...] = xn.astype(jnp.bfloat16)
    res_new_ref[...] = res_ref[...] + xn


def pallas_kg_aggregate(row_ptr, tail_s, etype_s, entity_f32, relation_p,
                        ent_res):
    Ep, Dp = entity_f32.shape
    R = relation_p.shape[0]
    n_tiles = Ep // TILE_ROWS

    kernel = functools.partial(kg_aggregate_kernel, tile_rows=TILE_ROWS)

    grid_spec = pltpu.PrefetchScalarGridSpec(
        num_scalar_prefetch=3,
        grid=(n_tiles,),
        in_specs=[
            pl.BlockSpec((Ep, Dp), lambda t, *_: (0, 0)),        # entity (resident)
            pl.BlockSpec((R, Dp), lambda t, *_: (0, 0)),         # relation (resident)
            pl.BlockSpec((TILE_ROWS, Dp), lambda t, *_: (t, 0)),  # residual tile
        ],
        out_specs=[
            pl.BlockSpec((TILE_ROWS, Dp), lambda t, *_: (t, 0)),  # ent_new
            pl.BlockSpec((TILE_ROWS, Dp), lambda t, *_: (t, 0)),  # ent_new bf16
            pl.BlockSpec((TILE_ROWS, Dp), lambda t, *_: (t, 0)),  # res_new
        ],
    )
    return pl.pallas_call(
        kernel,
        out_shape=(jax.ShapeDtypeStruct((Ep, Dp), jnp.float32),
                   jax.ShapeDtypeStruct((Ep, Dp), jnp.bfloat16),
                   jax.ShapeDtypeStruct((Ep, Dp), jnp.float32)),
        grid_spec=grid_spec,
        compiler_params=pltpu.CompilerParams(
            dimension_semantics=("parallel",),
            vmem_limit_bytes=48 * 1024 * 1024),
    )(row_ptr, tail_s, etype_s, entity_f32, relation_p, ent_res)


# ----------------------------------------------------------------------------
# Kernel 2: user aggregation + normalize + residual (fused)
#   score     = softmax(user_emb @ latent_emb.T, axis=1)
#   user_agg0 = interact_mat @ entity_emb       (tiled bf16 MXU, f32 acc)
#   user_agg  = (score @ disen_weight + 1) * user_agg0
#   user_new  = l2_normalize(user_agg, dim=1)
#   res_new   = user_res + user_new
# disen_weight = softmax(disen_weight_att) @ relation_emb is hoisted (loop
# invariant) into the wrapper.
# ----------------------------------------------------------------------------
def user_aggregate_kernel(user_ref, latent_ref, disenw_ref, interact_ref,
                          entity_ref, res_ref,
                          user_new_ref, res_new_ref,
                          acc_ref):
    k = pl.program_id(1)

    @pl.when(k == 0)
    def _():
        acc_ref[...] = jnp.zeros_like(acc_ref)

    # interact (bf16) @ entity (bf16) on the MXU, f32 accumulation.
    acc_ref[...] += jnp.dot(interact_ref[...], entity_ref[...],
                            preferred_element_type=jnp.float32)

    @pl.when(k == pl.num_programs(1) - 1)
    def _():
        score_ = lax.dot_general(user_ref[...], latent_ref[...],
                                 (((1,), (1,)), ((), ())),
                                 preferred_element_type=jnp.float32)   # (tU, F)
        score = jax.nn.softmax(score_, axis=1)
        mixed = jnp.dot(score, disenw_ref[...],
                        preferred_element_type=jnp.float32)            # (tU, D)
        user_agg = (mixed + 1.0) * acc_ref[...]
        ssq = jnp.sum(user_agg * user_agg, axis=1, keepdims=True)
        xn = user_agg * lax.rsqrt(ssq + 1e-24)        # F.normalize(dim=1)
        user_new_ref[...] = xn
        res_new_ref[...] = res_ref[...] + xn


def pallas_user_aggregate(user_p, latent_p, disenw_p, interact_bf16,
                          entity_bf16, user_res, *, tile_u, tile_e):
    Up, Dp = user_p.shape
    Ep = entity_bf16.shape[0]
    F_ = latent_p.shape[0]
    n_u = Up // tile_u
    n_e = Ep // tile_e

    grid_spec = pltpu.PrefetchScalarGridSpec(
        num_scalar_prefetch=0,
        grid=(n_u, n_e),
        in_specs=[
            pl.BlockSpec((tile_u, Dp), lambda i, k: (i, 0)),      # user
            pl.BlockSpec((F_, Dp), lambda i, k: (0, 0)),          # latent
            pl.BlockSpec((F_, Dp), lambda i, k: (0, 0)),          # disen weight
            pl.BlockSpec((tile_u, tile_e), lambda i, k: (i, k)),  # interact bf16
            pl.BlockSpec((tile_e, Dp), lambda i, k: (k, 0)),      # entity bf16
            pl.BlockSpec((tile_u, Dp), lambda i, k: (i, 0)),      # user residual
        ],
        out_specs=[
            pl.BlockSpec((tile_u, Dp), lambda i, k: (i, 0)),
            pl.BlockSpec((tile_u, Dp), lambda i, k: (i, 0)),
        ],
        scratch_shapes=[pltpu.VMEM((tile_u, Dp), jnp.float32)],
    )
    return pl.pallas_call(
        user_aggregate_kernel,
        out_shape=(jax.ShapeDtypeStruct((Up, Dp), jnp.float32),
                   jax.ShapeDtypeStruct((Up, Dp), jnp.float32)),
        grid_spec=grid_spec,
        compiler_params=pltpu.CompilerParams(
            dimension_semantics=("parallel", "arbitrary"),
            vmem_limit_bytes=32 * 1024 * 1024),
    )(user_p, latent_p, disenw_p, interact_bf16, entity_bf16, user_res)


# ----------------------------------------------------------------------------
# GraphConv.forward (dropout rates = 0 -> no edge sampling / dropout)
# ----------------------------------------------------------------------------
def graph_conv_forward(user_emb, entity_emb, latent_emb, relation_emb,
                       disen_weight_att, edge_index, edge_type, interact_mat,
                       n_hops, temperature):
    U, D = user_emb.shape
    E, _ = entity_emb.shape
    R = relation_emb.shape[0]
    F_ = latent_emb.shape[0]

    Dp = _round_up(D, LANE)
    tile_u = min(TILE_U_MAX, _round_up(U, 8))
    tile_e = min(TILE_E_MAX, _round_up(E, LANE))   # multiple of 128 (>= TILE_ROWS)
    Up = _round_up(U, tile_u)
    Ep = _round_up(E, tile_e)                      # also a multiple of TILE_ROWS

    def pad2(x, rows, cols):
        return jnp.pad(x, ((0, rows - x.shape[0]), (0, cols - x.shape[1])))

    # Lane-dense layout: pad embedding dim to 128 (zeros, exact).
    user_p = pad2(user_emb, Up, Dp)
    ent_p = pad2(entity_emb, Ep, Dp)
    lat_p = pad2(latent_emb, F_, Dp)
    rel_p = pad2(relation_emb, R, Dp)
    interact_bf16 = pad2(interact_mat, Up, Ep).astype(jnp.bfloat16)

    # -------- CSR edge preprocessing (static across hops, hoisted) -----------
    head = edge_index[0].astype(jnp.int32)
    tail = edge_index[1].astype(jnp.int32)
    etype = edge_type.astype(jnp.int32)
    order = jnp.argsort(head)
    head_s = head[order]
    tail_s = tail[order]
    etype_s = etype[order]
    row_ptr = jnp.searchsorted(
        head_s, jnp.arange(Ep + 1, dtype=jnp.int32)).astype(jnp.int32)

    # -------- loop-invariant precomputation (hoisted out of the hop loop) ----
    disen_weight = jnp.dot(jax.nn.softmax(disen_weight_att, axis=-1),
                           relation_emb)                         # (F, D)
    disen_weight_p = pad2(disen_weight, F_, Dp)

    ent_res, user_res = ent_p, user_p
    ent_cur, user_cur = ent_p, user_p
    ent_cur_bf16 = ent_p.astype(jnp.bfloat16)
    for _ in range(n_hops):
        ent_new, ent_new_bf16, ent_res = pallas_kg_aggregate(
            row_ptr, tail_s, etype_s, ent_cur, rel_p, ent_res)
        user_new, user_res = pallas_user_aggregate(
            user_cur, lat_p, disen_weight_p, interact_bf16, ent_cur_bf16,
            user_res, tile_u=tile_u, tile_e=tile_e)
        ent_cur, ent_cur_bf16, user_cur = ent_new, ent_new_bf16, user_new

    # MutualInformation cor-loss (ind == 'mi'); tiny (F x R) -> plain JAX.
    nt = disen_weight_att / jnp.maximum(
        jnp.linalg.norm(disen_weight_att, axis=1, keepdims=True), 1e-12)
    scores = jnp.exp(jnp.dot(nt, nt.T) / temperature)
    cor_loss = -jnp.sum(jnp.log(jnp.diag(scores) / jnp.sum(scores, axis=1)))

    return ent_res[:E, :D], user_res[:U, :D], cor_loss


# ----------------------------------------------------------------------------
# Pure-JAX reference (matches the PyTorch module, dropout off)
# ----------------------------------------------------------------------------
def reference_forward(user_emb, entity_emb, latent_emb, relation_emb,
                      disen_weight_att, edge_index, edge_type, interact_mat,
                      n_hops, temperature):
    head, tail = edge_index[0], edge_index[1]
    n_entities = entity_emb.shape[0]
    ent_res, user_res = entity_emb, user_emb
    ent, user = entity_emb, user_emb
    disen_weight = jax.nn.softmax(disen_weight_att, axis=-1) @ relation_emb
    for _ in range(n_hops):
        neigh = ent[tail] * relation_emb[edge_type]
        sums = jnp.zeros_like(ent).at[head].add(neigh)
        counts = jnp.zeros((n_entities,), jnp.float32).at[head].add(1.0)
        entity_agg = sums / jnp.maximum(counts, 1.0)[:, None]
        score = jax.nn.softmax(user @ latent_emb.T, axis=1)
        user_agg = interact_mat @ ent
        user_agg = (score @ disen_weight) * user_agg + user_agg
        ent = entity_agg / jnp.maximum(
            jnp.linalg.norm(entity_agg, axis=1, keepdims=True), 1e-12)
        user = user_agg / jnp.maximum(
            jnp.linalg.norm(user_agg, axis=1, keepdims=True), 1e-12)
        ent_res = ent_res + ent
        user_res = user_res + user
    nt = disen_weight_att / jnp.maximum(
        jnp.linalg.norm(disen_weight_att, axis=1, keepdims=True), 1e-12)
    scores = jnp.exp(nt @ nt.T / temperature)
    cor = -jnp.sum(jnp.log(jnp.diag(scores) / jnp.sum(scores, axis=1)))
    return ent_res, user_res, cor


if __name__ == "__main__":
    D = 32            # embedding_size
    n_users = 16
    n_entities = 24
    n_relations = 8
    n_factors = 4
    n_edges = 64
    n_hops = 2
    temperature = 0.2

    key = jax.random.PRNGKey(0)
    ks = jax.random.split(key, 10)

    user_emb = 0.1 * jax.random.normal(ks[0], (n_users, D), jnp.float32)
    entity_emb = 0.1 * jax.random.normal(ks[1], (n_entities, D), jnp.float32)
    latent_emb = 0.1 * jax.random.normal(ks[2], (n_factors, D), jnp.float32)

    # parameters: xavier_uniform-style deterministic init
    rel_bound = (6.0 / (n_relations + D)) ** 0.5
    relation_emb = jax.random.uniform(ks[3], (n_relations, D), jnp.float32,
                                      -rel_bound, rel_bound)
    dis_bound = (6.0 / (n_factors + n_relations)) ** 0.5
    disen_weight_att = jax.random.uniform(ks[4], (n_factors, n_relations),
                                          jnp.float32, -dis_bound, dis_bound)

    # knowledge graph edges: edge_index = [head; tail], edge_type
    edge_index = jax.random.randint(ks[5], (2, n_edges), 0, n_entities, jnp.int32)
    edge_type = jax.random.randint(ks[6], (n_edges,), 0, n_relations, jnp.int32)

    # densified user-entity interaction matrix (stands in for torch.sparse.mm)
    interact = (jax.random.uniform(ks[7], (n_users, n_entities)) < 0.2
                ).astype(jnp.float32)
    interact = interact / jnp.maximum(interact.sum(axis=1, keepdims=True), 1.0)

    entity_res, user_res, cor_loss = graph_conv_forward(
        user_emb, entity_emb, latent_emb, relation_emb, disen_weight_att,
        edge_index, edge_type, interact, n_hops, temperature)
    jax.block_until_ready((entity_res, user_res, cor_loss))

    ent_ref, usr_ref, cor_ref = reference_forward(
        user_emb, entity_emb, latent_emb, relation_emb, disen_weight_att,
        edge_index, edge_type, interact, n_hops, temperature)

    assert entity_res.shape == (n_entities, D)
    assert user_res.shape == (n_users, D)
    assert bool(jnp.all(jnp.isfinite(entity_res)))
    assert bool(jnp.all(jnp.isfinite(user_res)))
    assert bool(jnp.isfinite(cor_loss))
    # entity path is f32 throughout; user path uses bf16 interact/entity on MXU
    assert bool(jnp.allclose(entity_res, ent_ref, rtol=2e-3, atol=2e-3))
    assert bool(jnp.allclose(user_res, usr_ref, rtol=6e-2, atol=6e-2))
    assert bool(jnp.allclose(cor_loss, cor_ref, rtol=1e-4, atol=1e-4))
    print("KERNEL_OK")
</pallas_src>

<mosaic_0001>
module attributes {stable_mosaic.version = 11 : i64} {
  func.func @kg_aggregate_kernel(%arg0: i32, %arg1: memref<129xi32, #tpu.memory_space<smem>>, %arg2: memref<64xi32, #tpu.memory_space<smem>>, %arg3: memref<64xi32, #tpu.memory_space<smem>>, %arg4: memref<128x128xf32, #tpu.memory_space<vmem>>, %arg5: memref<8x128xf32, #tpu.memory_space<vmem>>, %arg6: memref<32x128xf32, #tpu.memory_space<vmem>>, %arg7: memref<32x128xf32, #tpu.memory_space<vmem>>, %arg8: memref<32x128xbf16, #tpu.memory_space<vmem>>, %arg9: memref<32x128xf32, #tpu.memory_space<vmem>>) attributes {dimension_semantics = [#tpu.dimension_semantics<parallel>], iteration_bounds = array<i64: 4>, scalar_prefetch = 3 : i64, scratch_operands = 0 : i64, tpu.core_type = #tpu.core_type<tc>, window_params = [{pipeline_mode = #tpu.pipeline_mode<synchronous>, transform_indices = @transform_0, window_bounds = array<i64: 128, 128>}, {pipeline_mode = #tpu.pipeline_mode<synchronous>, transform_indices = @transform_1, window_bounds = array<i64: 8, 128>}, {transform_indices = @transform_2, window_bounds = array<i64: 32, 128>}, {transform_indices = @transform_3, window_bounds = array<i64: 32, 128>}, {transform_indices = @transform_4, window_bounds = array<i64: 32, 128>}, {transform_indices = @transform_5, window_bounds = array<i64: 32, 128>}]} {
    %c32_i32 = arith.constant 32 : i32
    %0 = arith.muli %arg0, %c32_i32 : i32
    %c0_i32 = arith.constant 0 : i32
    %c32_i32_0 = arith.constant 32 : i32
    %1 = arith.addi %c0_i32, %c32_i32_0 : i32
    %c1_i32 = arith.constant 1 : i32
    scf.for %arg10 = %c0_i32 to %1 step %c1_i32  : i32 {
      %17 = arith.addi %0, %arg10 : i32
      %18 = arith.index_cast %17 : i32 to index
      %19 = memref.load %arg1[%18] : memref<129xi32, #tpu.memory_space<smem>>
      %20 = arith.addi %0, %arg10 : i32
      %c1_i32_12 = arith.constant 1 : i32
      %21 = arith.addi %20, %c1_i32_12 : i32
      %22 = arith.index_cast %21 : i32 to index
      %23 = memref.load %arg1[%22] : memref<129xi32, #tpu.memory_space<smem>>
      %cst_13 = arith.constant 0.000000e+00 : f32
      %24 = vector.broadcast %cst_13 : f32 to vector<1x128xf32>
      %25 = arith.subi %23, %19 : i32
      %26 = arith.addi %19, %25 : i32
      %c1_i32_14 = arith.constant 1 : i32
      %27 = scf.for %arg11 = %19 to %26 step %c1_i32_14 iter_args(%arg12 = %24) -> (vector<1x128xf32>)  : i32 {
        %30 = arith.index_cast %arg11 : i32 to index
        %31 = memref.load %arg2[%30] : memref<64xi32, #tpu.memory_space<smem>>
        %32 = arith.index_cast %arg11 : i32 to index
        %33 = memref.load %arg3[%32] : memref<64xi32, #tpu.memory_space<smem>>
        %34 = arith.index_cast %31 : i32 to index
        %c0_16 = arith.constant 0 : index
        %35 = vector.load %arg4[%34, %c0_16] : memref<128x128xf32, #tpu.memory_space<vmem>>, vector<1x128xf32>
        %36 = arith.index_cast %33 : i32 to index
        %c0_17 = arith.constant 0 : index
        %37 = vector.load %arg5[%36, %c0_17] : memref<8x128xf32, #tpu.memory_space<vmem>>, vector<1x128xf32>
        %38 = arith.mulf %35, %37 : vector<1x128xf32>
        %39 = arith.addf %arg12, %38 : vector<1x128xf32>
        scf.yield %39 : vector<1x128xf32>
      }
      %28 = arith.index_cast %arg10 : i32 to index
      %c0_15 = arith.constant 0 : index
      %29 = vector.load %arg7[%28, %c0_15] : memref<32x128xf32, #tpu.memory_space<vmem>>, vector<1x128xf32>
      tpu.vector_store %arg7[%28, %c0_15], %27 {strides = array<i32>} : memref<32x128xf32, #tpu.memory_space<vmem>>, vector<1x128xf32>,
    }
    %c32_i32_1 = arith.constant 32 : i32
    %c0 = arith.constant 0 : index
    %c0_2 = arith.constant 0 : index
    %2 = vector.load %arg7[%c0, %c0_2] : memref<32x128xf32, #tpu.memory_space<vmem>>, vector<32x128xf32>
    %3 = arith.mulf %2, %2 : vector<32x128xf32>
    %cst = arith.constant dense<0.000000e+00> : vector<32xf32>
    %4 = vector.multi_reduction <add>, %3, %cst [1] : vector<32x128xf32> to vector<32xf32>
    %5 = vector.shape_cast %4 : vector<32xf32> to vector<32x1xf32>
    %cst_3 = arith.constant 1.000000e-24 : f32
    %6 = vector.broadcast %cst_3 : f32 to vector<32x1xf32>
    %7 = arith.addf %5, %6 : vector<32x1xf32>
    %8 = math.rsqrt %7 : vector<32x1xf32>
    %9 = vector.broadcast %8 : vector<32x1xf32> to vector<32x128xf32>
    %10 = arith.mulf %2, %9 : vector<32x128xf32>
    %c0_4 = arith.constant 0 : index
    %c0_5 = arith.constant 0 : index
    %11 = vector.load %arg7[%c0_4, %c0_5] : memref<32x128xf32, #tpu.memory_space<vmem>>, vector<32x128xf32>
    tpu.vector_store %arg7[%c0_4, %c0_5], %10 {strides = array<i32>} : memref<32x128xf32, #tpu.memory_space<vmem>>, vector<32x128xf32>,
    %12 = arith.truncf %10 : vector<32x128xf32> to vector<32x128xbf16>
    %c0_6 = arith.constant 0 : index
    %c0_7 = arith.constant 0 : index
    %13 = vector.load %arg8[%c0_6, %c0_7] : memref<32x128xbf16, #tpu.memory_space<vmem>>, vector<32x128xbf16>
    tpu.vector_store %arg8[%c0_6, %c0_7], %12 {strides = array<i32>} : memref<32x128xbf16, #tpu.memory_space<vmem>>, vector<32x128xbf16>,
    %c0_8 = arith.constant 0 : index
    %c0_9 = arith.constant 0 : index
    %14 = vector.load %arg6[%c0_8, %c0_9] : memref<32x128xf32, #tpu.memory_space<vmem>>, vector<32x128xf32>
    %15 = arith.addf %14, %10 : vector<32x128xf32>
    %c0_10 = arith.constant 0 : index
    %c0_11 = arith.constant 0 : index
    %16 = vector.load %arg9[%c0_10, %c0_11] : memref<32x128xf32, #tpu.memory_space<vmem>>, vector<32x128xf32>
    tpu.vector_store %arg9[%c0_10, %c0_11], %15 {strides = array<i32>} : memref<32x128xf32, #tpu.memory_space<vmem>>, vector<32x128xf32>,
    return
  }
  func.func @transform_0(%arg0: i32, %arg1: memref<129xi32, #tpu.memory_space<smem>>, %arg2: memref<64xi32, #tpu.memory_space<smem>>, %arg3: memref<64xi32, #tpu.memory_space<smem>>) -> (i32, i32) {
    %c0_i32 = arith.constant 0 : i32
    %c0_i32_0 = arith.constant 0 : i32
    %c0_i32_1 = arith.constant 0 : i32
    return %c0_i32, %c0_i32_0 : i32, i32
  }
  func.func @transform_1(%arg0: i32, %arg1: memref<129xi32, #tpu.memory_space<smem>>, %arg2: memref<64xi32, #tpu.memory_space<smem>>, %arg3: memref<64xi32, #tpu.memory_space<smem>>) -> (i32, i32) {
    %c0_i32 = arith.constant 0 : i32
    %c0_i32_0 = arith.constant 0 : i32
    %c0_i32_1 = arith.constant 0 : i32
    return %c0_i32, %c0_i32_0 : i32, i32
  }
  func.func @transform_2(%arg0: i32, %arg1: memref<129xi32, #tpu.memory_space<smem>>, %arg2: memref<64xi32, #tpu.memory_space<smem>>, %arg3: memref<64xi32, #tpu.memory_space<smem>>) -> (i32, i32) {
    %c0_i32 = arith.constant 0 : i32
    %c0_i32_0 = arith.constant 0 : i32
    return %arg0, %c0_i32 : i32, i32
  }
  func.func @transform_3(%arg0: i32, %arg1: memref<129xi32, #tpu.memory_space<smem>>, %arg2: memref<64xi32, #tpu.memory_space<smem>>, %arg3: memref<64xi32, #tpu.memory_space<smem>>) -> (i32, i32) {
    %c0_i32 = arith.constant 0 : i32
    %c0_i32_0 = arith.constant 0 : i32
    return %arg0, %c0_i32 : i32, i32
  }
  func.func @transform_4(%arg0: i32, %arg1: memref<129xi32, #tpu.memory_space<smem>>, %arg2: memref<64xi32, #tpu.memory_space<smem>>, %arg3: memref<64xi32, #tpu.memory_space<smem>>) -> (i32, i32) {
    %c0_i32 = arith.constant 0 : i32
    %c0_i32_0 = arith.constant 0 : i32
    return %arg0, %c0_i32 : i32, i32
  }
  func.func @transform_5(%arg0: i32, %arg1: memref<129xi32, #tpu.memory_space<smem>>, %arg2: memref<64xi32, #tpu.memory_space<smem>>, %arg3: memref<64xi32, #tpu.memory_space<smem>>) -> (i32, i32) {
    %c0_i32 = arith.constant 0 : i32
    %c0_i32_0 = arith.constant 0 : i32
    return %arg0, %c0_i32 : i32, i32
  }
}

</mosaic_0001>

<bundles_post_ra>
// kernel: tpu_custom_call.1
= control target key start
LH: loop header
LB: loop body
LE: loop exit
PB: predicated region body
PF: predicated region fallthrough
CT: control target
= control target key end

     0   :  { %s1074_s27 = smov [#allocation3]   ;;  %s1463_s0 = inlined_call_operand.hbm [shape: s32[129], index: 0, kind: input, shape index: {}]   ;;  %s1464_s3 = inlined_call_operand.hbm [shape: f32[128,128], index: 3, kind: input, shape index: {}]   ;;  %s1465_s4 = inlined_call_operand.hbm [shape: f32[8,128], index: 4, kind: input, shape index: {}]   ;;  %s1466_s5 = inlined_call_operand.hbm [shape: f32[128,128], index: 5, kind: input, shape index: {}]   ;;  %s1467_s6 = inlined_call_operand.hbm [shape: f32[128,128], index: 6, kind: output, shape index: {0}]   ;;  %s1468_s7 = inlined_call_operand.hbm [shape: bf16[128,128], index: 7, kind: output, shape index: {1}]   ;;  %s1469_s8 = inlined_call_operand.hbm [shape: f32[128,128], index: 8, kind: output, shape index: {2}]   ;;  %s1470_s1 = inlined_call_operand.vmem [shape: s32[64], index: 1, kind: input, shape index: {}]   ;;  %s1471_s2 = inlined_call_operand.vmem [shape: s32[64], index: 2, kind: input, shape index: {}]  }
   0x1   :  { %1479 = sst [smem:[#allocation22_spill]] %s1464_s3  ;;  %s16_s10 = sshll.u32 %s1470_s1, 4  ;;  %s17_s10 = int_to_ptr.vmem [resolvable:$true] %s16_s10 }
   0x2   :  { %1480 = sst [smem:[#allocation23_spill]] %s1465_s4  ;;  %s20_s13 = sshll.u32 %s1471_s2, 4  ;;  %s21_s13 = int_to_ptr.vmem [resolvable:$true] %s20_s13 }
   0x3   :  { %15 = dma.hbm_to_smem %s1463_s0, 32, %s1074_s27, [#allocation2] }
   0x4   :  { %s806_s14 = scalar_lea.vmem %s17_s10, 16  ;;  %p811_p1 = scmp.lt.s32.totalorder %s17_s10, %s17_s10 }
   0x5   :  { %p807_p0 = scmp.ne.s32.totalorder %s17_s10, %s806_s14  ;;  %p812_p2 = scmp.lt.s32.totalorder %s806_s14, %s806_s14 }
   0x7   :  { %p813_p3 = por %p812_p2, %p811_p1 }
   0x9   :  { %p814_p4 = pnand %p813_p3, %p807_p0 }
   0xb   :  { %817 = shalt.err (!%p814_p4)  }
   0xc   :  { %s1075_s15 = smov [#allocation4]   ;;  %s818_s0 = scalar_lea.vmem %s21_s13, 16 }
   0xd   :  { %19 = dma.vmem_to_smem %s17_s10, 16, %s1075_s15, [#allocation2] }
   0xe   :  { %p819_p5 = scmp.ne.s32.totalorder %s21_s13, %s818_s0  ;;  %p823_p6 = scmp.lt.s32.totalorder %s21_s13, %s21_s13 }
   0xf   :  { %p824_p7 = scmp.lt.s32.totalorder %s818_s0, %s818_s0 }
  0x11   :  { %p825_p8 = por %p824_p7, %p823_p6 }
  0x13   :  { %p826_p9 = pnand %p825_p8, %p819_p5 }
  0x15   :  { %829 = shalt.err (!%p826_p9)  }
  0x16   :  { %s1076_s1 = smov [#allocation5]  }
  0x17   :  { %23 = dma.vmem_to_smem %s21_s13, 16, %s1076_s1, [#allocation2] }
  0x18   :  { %1020 = dma.done.wait [#allocation2], 64 }
  0x19   :  { %1021 = vsyncadd [#allocation2], 4294967232 }
  0x1a   :  { %25 = sfence }
  0x1b   :  { %26 = vsyncpa [#allocation7], 0 }
  0x1c   :  { %27 = vsyncpa [#allocation10], 0 }
  0x1d   :  { %28 = vsyncpa [#allocation8], 0 }
  0x1e   :  { %30 = vsyncpa [#allocation8 + $0x1], 0 }
  0x1f   :  { %31 = vsyncpa [#allocation14], 0 }
  0x20   :  { %33 = vsyncpa [#allocation14 + $0x1], 0  ;;  %s1143_s2 = smov 0   ;;  %s1145_s16 = smov 0  }
  0x21   :  { %s1147_s17 = smov 0   ;;  %s1149_s18 = smov 0  }
  0x22 LB: > { %s1164_s19 = sadd.s32 4294967295, %s1056_s18   ;;  %s1474_s20 = sadd.s32 4294967294, %s1056_s18   ;;  %s1056_s18 = sphi %s1149_s18, %s1505_s18   ;;  %s1052_s17 = sphi %s1147_s17, %s1504_s17   ;;  %s1048_s16 = sphi %s1145_s16, %s1503_s16   ;;  %s1044_s2 = sphi %s1143_s2, %s1502_s2  }
  0x23   : > { %s1168_s21 = sadd.s32 1, %s1056_s18   ;;  %s88_s22 = sadd.s32 1, %s1052_s17 }
  0x24   : > { %s85_s23 = ssub.s32 %s1056_s18, %s1168_s21  ;;  %p95_p10 = scmp.ne.s32.totalorder %s1052_s17, %s1048_s16 }
  0x25   : > { %p86_p11 = scmp.eq.s32.totalorder %s85_s23, 0  ;;  %p96_p12 = scmp.eq.s32.totalorder %s1056_s18, 0 }
  0x26   : > { %p101_p13 = scmp.ne.s32.totalorder %s1048_s16, %s1044_s2  ;;  %p1473_p0 = scmp.eq.s32.totalorder %s1164_s19, 0 }
  0x27   : > { %s1180_s24 = scalar_select %p86_p11, %s1052_s17, %s88_s22  }
  0x28   : > { %p1182_p1 = por %p96_p12, %p95_p10  ;;  %p1188_p2 = por %p1473_p0, %p101_p13 }
  0x29   : > { %p125_p3 = scmp.eq.s32.totalorder %s1164_s19, 3  ;;  %p131_p4 = scmp.eq.s32.totalorder %s1474_s20, 3 }
  0x2a   : > { %s1482_s26 = scalar_select %p1188_p2, 1, 0 }
  0x2b   : > { %p623_p5 = scmp.ge.s32.totalorder %s1056_s18, 1  ;;  %p190_p6 = scmp.lt.s32.totalorder %s1056_s18, 5 }
  0x2c   : > { %p1197_p7 = por %p125_p3, %p95_p10  ;;  %p1201_p8 = por %p131_p4, %p101_p13 }
  0x2d   : > { %p1205_p9 = pnand %p623_p5, %p190_p6  ;;  %s1077_s30 = smov [#allocation6]  }
  0x2e   : > { %s1483_s27 = scalar_select %p1197_p7, 1, 0 }
  0x2f   : > { %s1484_s28 = scalar_select %p1201_p8, 1, 0 }
  0x30   : > { %s1485_s29 = scalar_select %p1205_p9, 1, 0 }
  0x31   : > { %p688_p11 = pneg %p1205_p9  ;;  %s202_s9 = sshll.u32 %s1077_s30, 4  ;;  %s203_s9 = int_to_ptr.vmem [resolvable:$true] %s202_s9 }
  0x32   : > { %p711_p10 = scmp.lt.s32.totalorder %s1056_s18, 4  ;;  %s1078_s11 = smov [#allocation9]  }
  0x33   : > { %p1213_p12 = pnand %p688_p11, %p1473_p0  ;;  %s216_s12 = sshll.u32 %s1078_s11, 4  ;;  %s217_s12 = int_to_ptr.vmem [resolvable:$true] %s216_s12 }
  0x34   : > { %s841_s13 = scalar_lea.vmem %s203_s9, 2048  ;;  %p849_p6 = scmp.lt.s32.totalorder %s203_s9, %s203_s9 }
  0x35   : > { %p832_p13 = pneg %p1213_p12  ;;  %p842_p3 = scmp.ne.s32.totalorder %s203_s9, %s841_s13 }
  0x36   : > { %p850_p8 = scmp.lt.s32.totalorder %s841_s13, %s841_s13 }
  0x37   : > { %p844_p4 = pnand %p842_p3, %p832_p13 }
  0x38   : > { %p851_p7 = por %p850_p8, %p849_p6 }
  0x39   : > { %p845_p5 = pneg %p844_p4 }
  0x3b   : > { %p852_p11 = pnand %p851_p7, %p845_p5 }
  0x3d   : > { %855 = shalt.err (!%p852_p11)
}
  0x3e   : > { %s1475_s14 = smov 128   ;;  %s1080_s15 = smov 8  }
  0x3f   : > { %s1487_s3 = sld [smem:[#allocation22_spill]]  ;;  %p1235_p3 = pnand %p711_p10, %p1182_p1 }
  0x40   : > { %s867_s23 = scalar_lea.vmem %s217_s12, 128  ;;  %p875_p5 = scmp.lt.s32.totalorder %s217_s12, %s217_s12 }
  0x41   : > { %p868_p7 = scmp.ne.s32.totalorder %s217_s12, %s867_s23  ;;  %p876_p6 = scmp.lt.s32.totalorder %s867_s23, %s867_s23 }
  0x43   : > { %p870_p8 = pnand %p868_p7, %p832_p13  ;;  %p877_p11 = por %p876_p6, %p875_p5 }
  0x45   : > { %691 = dma.hbm_to_vmem [thread:$0]  (!%p1213_p12), %s1487_s3, 2048, %s203_s9, [#allocation7], %s1475_s14, %s1475_s14, %s1080_s15  }
  0x46   : > { %p871_p4 = pneg %p870_p8 }
  0x48   : > { %p878_p0 = pnand %p877_p11, %p871_p4 }
  0x4a   : > { %881 = shalt.err (!%p878_p0)
}
  0x4b   : > { %s1489_s4 = sld [smem:[#allocation23_spill]]  ;;  %s227_s9 = sand.u32 1, %s1056_s18  }
  0x4c   : > { %s229_s11 = sand.u32 1, %s1052_s17   ;;  %s653_s0 = sshll.u32 %s1056_s18, 9 }
  0x4d   : > { %s627_s13 = sshll.u32 %s229_s11, 5  ;;  %s1253_s23 = scalar_lea.hbm %s1466_s5, %s653_s0 }
  0x4e   : > { %s231_s10 = scalar_lea.vmem [#allocation11], %s627_s13  ;;  %s1257_s25 = scalar_lea.sflag [#allocation7], %s227_s9 }
  0x4f   : > { %s238_s14 = sshll.u32 %s231_s10, 4  ;;  %s882_s30 = scalar_lea.hbm %s1253_s23, 512  ;;  %s1255_s14 = int_to_ptr.vmem [resolvable:$true] %s238_s14 }
  0x50   : > { %p883_p0 = scmp.ne.s32.totalorder %s1253_s23, %s882_s30  ;;  %p884_p1 = pneg %p1235_p3 }
  0x51   : > { %694 = dma.hbm_to_vmem [thread:$0]  (!%p1213_p12), %s1489_s4, 128, %s217_s12, [#allocation10]  }
  0x52   : > { %p885_p12 = pnand %p884_p1, %p883_p0  ;;  %s887_s20 = scalar_lea.hbm %s1466_s5, 2048 }
  0x53   : > { %p888_p13 = scmp.lt.s32.totalorder %s1253_s23, %s1466_s5  ;;  %p889_p7 = scmp.lt.s32.totalorder %s887_s20, %s882_s30 }
  0x54   : > { %p886_p10 = pneg %p885_p12 }
  0x55   : > { %p890_p8 = por %p889_p7, %p888_p13 }
  0x57   : > { %p891_p4 = pnand %p890_p8, %p886_p10 }
  0x59   : > { %894 = shalt.err (!%p891_p4)
}
  0x5a   : > { %s895_s9 = scalar_lea.vmem %s1255_s14, 512  ;;  %s1081_s13 = smov [#allocation11]  }
  0x5b   : > { %p896_p5 = scmp.ne.s32.totalorder %s1255_s14, %s895_s9  ;;  %s900_s10 = sshll.u32 %s1081_s13, 4  ;;  %s901_s10 = int_to_ptr.vmem [resolvable:$false] %s900_s10 }
  0x5c   : > { %s902_s12 = scalar_lea.vmem %s901_s10, 1024  ;;  %p903_p0 = scmp.lt.s32.totalorder %s1255_s14, %s901_s10 }
  0x5d   : > { %p898_p6 = pnand %p896_p5, %p884_p1  ;;  %p904_p12 = scmp.lt.s32.totalorder %s902_s12, %s895_s9 }
  0x5f   : > { %p899_p11 = pneg %p898_p6  ;;  %p905_p2 = por %p904_p12, %p903_p0 }
  0x61   : > { %p906_p9 = pnand %p905_p2, %p899_p11 }
  0x63   : > { %909 = shalt.err (!%p906_p9)
}
  0x64   : > { %s1490_s30 = smov 128   ;;  %p1491_p1 = scmp.ne.s32.totalorder %s1485_s29, 0 }
  0x65   : > { %698 = dma.hbm_to_vmem [thread:$0]  (!%p1235_p3), %s1253_s23, 512, %s1255_s14, %s1257_s25, %s1490_s30, %s1490_s30, %s1080_s15  }
  0x66   : > { %250 = sbr.rel (%p1491_p1) target bundleno = 387 (0x183), region = 32  ;;  %p1492_p10 = scmp.eq.s32.totalorder (!%p1491_p1), %s1164_s19, 0 }
  0x6b   : > { %1023 = dma.done.wait (%p1492_p10), [#allocation7], 2048   ;;  %p1493_p13 = pmov %p1492_p10 }
  0x6c   : > { %p1494_p2 = pmov %p1492_p10 }
  0x6d   : > { %1025 = vsyncadd (%p1493_p13), [#allocation7], 4294965248 }
  0x6e   : > { %1027 = dma.done.wait (%p1494_p2), [#allocation10], 128   ;;  %p1495_p9 = pmov %p1494_p2 }
  0x6f   : > { %s1478_s14 = sand.u32 1, %s1164_s19   ;;  %s1293_s15 = sand.u32 1, %s1048_s16  }
  0x70   : > { %1029 = vsyncadd (%p1495_p9), [#allocation10], 4294967168  ;;  %s633_s29 = sshll.u32 %s1293_s15, 5  ;;  %s261_s22 = scalar_lea.sflag [#allocation7], %s1478_s14 }
  0x71   : > { %s1298_s23 = scalar_lea.vmem [#allocation11], %s633_s29  ;;  %p1496_p3 = scmp.ne.s32.totalorder %s1482_s26, 0 }
  0x73   : > { %1031 = dma.done.wait (%p1496_p3), %s261_s22, 512  }
  0x74   : > { %1033 = vsyncadd (%p1496_p3), %s261_s22, 4294966784  ;;  %s635_s25 = sshll.u32 %s1293_s15, 4  ;;  %s637_s11 = sshll.u32 %s1164_s19, 5 }
  0x75   : > { %s1306_s20 = scalar_lea.vmem [#allocation12], %s633_s29  ;;  %s1308_s0 = scalar_lea.vmem [#allocation13], %s635_s25 }
  0x76   : > { %s1310_s1 = scalar_lea.vmem [#allocation15], %s633_s29  ;;  %s1312_s9 = smov 0  }
  0x77 LB: >> { %s312_s26 = sadd.s32 %s1060_s9, %s637_s11  ;;  %v1070_v0 = vmov 0.0   ;;  %s1060_s9 = sphi %s1312_s9, %s311_s9  }
  0x78   : >> { %s313_s13 = sld [smem:[#allocation3 + %s312_s26]]   ;;  %s314_s10 = sadd.s32 1, %s312_s26 }
  0x79   : >> { %s315_s12 = sld [smem:[#allocation3 + %s314_s10]] }
  0x7f   : >> { %p550_p7 = scmp.ge.s32.totalorder %s313_s13, %s315_s12 }
  0x80   : >> { %s1066_s30 = smov (!%p550_p7), %s313_s13  }
  0x81   : >> { %552 = sbr.rel (%p550_p7) target bundleno = 149 (0x95), region = 127 }
  0x86   : >> { %v1062_v1 = vmov 0.0  }
  0x87 LB: >>> { %s323_s29 = sld [smem:[#allocation4 + %s1068_s30]]  ;;  %s1068_s30 = sphi %s1066_s30, %s319_s30   ;;  %v1064_v1 = vphi %v1062_v1, %v1063_v1  }
  0x88   : >>> { %s324_s22 = sld [smem:[#allocation5 + %s1068_s30]]  ;;  %s319_s30 = sadd.s32 1, %s1068_s30  }
  0x89   : >>> { %p318_p8 = scmp.ge.s32.totalorder %s319_s30, %s315_s12 }
  0x8d   : >>> { %s325_s25 = scalar_lea.vmem [#allocation6], %s323_s29 }
  0x8e   : >>> { %v326_v2 = vld [vmem:[%s325_s25] sm:$0x1]  ;;  %s327_s14 = scalar_lea.vmem [#allocation9], %s324_s22 }
  0x8f   : >>> { %v328_v3 = vld [vmem:[%s327_s14] sm:$0x1] }
  0x90   : >>> { %v329_v4 = vmul.f32 %v328_v3, %v326_v2  ;;  %321 = sbr.rel (!%p318_p8) target bundleno = 135 (0x87), region = 133 }
  0x92   : >>> { %v330_v5 = vadd.f32 %v1064_v1, %v329_v4  }
  0x94   : >>> { %v1063_v1 = vmov %v330_v5   ;;  %v1071_v0 = vmov (%p318_p8), %v330_v5  }
  0x95 PF: >> { %s331_s26 = scalar_lea.vmem %s1306_s20, %s1060_s9 [#allocation12]  ;;  %s311_s9 = sadd.s32 1, %s1060_s9   ;;  %v1072_v0 = vphi %v1070_v0, %v1071_v0  }
  0x96   : >> { %332 = vst [vmem:[%s331_s26] sm:$0x1] %v1072_v0  ;;  %p308_p4 = scmp.ge.s32.totalorder %s311_s9, 32  }
  0x97   : > { %v387_v23 = vld [vmem:[%s1298_s23 + $0x10] sm:$0xff] (%p308_p4)  ;;  %s659_s14 = sshll.u32 (%p308_p4), %s1164_s19, 8  ;;  %s437_s11 = sshll.u32 (%p308_p4), %s1308_s0, 4  ;;  %v385_v26 = vld [vmem:[%s1298_s23] sm:$0xff] (%p308_p4)  ;;  %v388_v31 = vld [vmem:[%s1298_s23 + $0x18] sm:$0xff] (%p308_p4)  ;;  %s1341_s11 = int_to_ptr.vmem [resolvable:$true] %s437_s11 }
  0x98   : > { %310 = sbr.rel (!%p308_p4) target bundleno = 119 (0x77), region = 144  ;;  %s658_s9 = sshll.u32 (%p308_p4), %s1164_s19, 9  ;;  %v386_v34 = vld [vmem:[%s1298_s23 + $0x8] sm:$0xff] (%p308_p4) }
  0x99   : > { %s421_s13 = sshll.u32 (%p308_p4), %s1306_s20, 4  ;;  %s1339_s30 = scalar_lea.hbm (%p308_p4), %s1468_s7, %s659_s14  ;;  %s1352_s13 = int_to_ptr.vmem [resolvable:$true] %s421_s13 }
  0x9a   : > { %s1348_s25 = scalar_lea.hbm (%p308_p4), %s1467_s6, %s658_s9  ;;  %s453_s26 = sshll.u32 (%p308_p4), %s1310_s1, 4  ;;  %s1363_s26 = int_to_ptr.vmem [resolvable:$true] %s453_s26 }
  0x9b   : > { %s1361_s12 = scalar_lea.hbm (%p308_p4), %s1469_s8, %s658_s9  ;;  %s910_s29 = scalar_lea.vmem (%p308_p4), %s1352_s13, 512 }
  0x9c   : > { %p911_p5 = scmp.ne.s32.totalorder (%p308_p4), %s1352_s13, %s910_s29  ;;  %p1497_p6 = scmp.ne.s32.totalorder (%p308_p4), %s1483_s27, 0 }
  0x9d   : > { %v335_v6 = vld [vmem:[%s1306_s20 + $0x10] sm:$0xff]  ;;  %v333_v7 = vld [vmem:[%s1306_s20] sm:$0xff]  ;;  %v336_v8 = vld [vmem:[%s1306_s20 + $0x18] sm:$0xff]  ;;  %s1082_s22 = smov [#allocation12]  }
  0x9e   : > { %v339_v9 = vmul.f32 %v335_v6, %v335_v6  ;;  %v337_v10 = vmul.f32 %v333_v7, %v333_v7  ;;  %v334_v11 = vld [vmem:[%s1306_s20 + $0x8] sm:$0xff]  ;;  %v340_v12 = vmul.f32 %v336_v8, %v336_v8  ;;  %p912_p11 = pnand %p911_p5, %p1497_p6 }
  0x9f   : > { %v338_v13 = vmul.f32 %v334_v11, %v334_v11 }
  0xa0   : > { %345 = vadd.xlane.f32.xlu1 %v339_v9  ;;  %341 = vadd.xlane.f32.xlu0 %v337_v10  ;;  %p913_p0 = pneg %p912_p11 }
  0xa4   : > { %347 = vadd.xlane.f32.xlu1 %v340_v12  ;;  %343 = vadd.xlane.f32.xlu0 %v338_v13 }
 0x129   : > { %v346_v14 = vpop.xlane.xlu1 %345  ;;  %v342_v15 = vpop.xlane.xlu0 %341 }
 0x12a   : > { %v351_v16 = vadd.f32 1e-24, %v346_v14  ;;  %v349_v17 = vadd.f32 1e-24, %v342_v15 }
 0x12c   : > { %790 = vrsqrt.f32 %v351_v16 }
 0x12d   : > { %792 = vrsqrt.f32 %v349_v17  ;;  %v348_v18 = vpop.xlane.xlu1 %347  ;;  %v344_v19 = vpop.xlane.xlu0 %343 }
 0x12e   : > { %v352_v20 = vadd.f32 1e-24, %v348_v18  ;;  %v350_v21 = vadd.f32 1e-24, %v344_v19 }
 0x130   : > { %794 = vrsqrt.f32 %v352_v20 }
 0x131   : > { %796 = vrsqrt.f32 %v350_v21 }
 0x139   : > { %v791_v22 = vpop.eup %790 }
 0x13a   : > { %v793_v24 = vpop.eup %792  ;;  %v359_v25 = vmul.f32 %v791_v22, %v335_v6 }
 0x13b   : > { %v357_v27 = vmul.f32 %v793_v24, %v333_v7 }
 0x13c   : > { %363 = vst [vmem:[%s1306_s20 + $0x10] sm:$0xff] %v359_v25  ;;  %v391_v28 = vadd.f32 %v387_v23, %v359_v25 }
 0x13d   : > { %v795_v29 = vpop.eup %794  ;;  %361 = vst [vmem:[%s1306_s20] sm:$0xff] %v357_v27  ;;  %v389_v30 = vadd.f32 %v385_v26, %v357_v27 }
 0x13e   : > { %v797_v32 = vpop.eup %796  ;;  %395 = vst [vmem:[%s1310_s1 + $0x10] sm:$0xff] %v391_v28  ;;  %v360_v33 = vmul.f32 %v795_v29, %v336_v8 }
 0x13f   : > { %393 = vst [vmem:[%s1310_s1] sm:$0xff] %v389_v30  ;;  %v358_v35 = vmul.f32 %v797_v32, %v334_v11 }
 0x140   : > { %364 = vst [vmem:[%s1306_s20 + $0x18] sm:$0xff] %v360_v33  ;;  %v392_v36 = vadd.f32 %v388_v31, %v360_v33  ;;  %v669_v37 = vpack.c.bf16 %v360_v33, %v359_v25 }
 0x141   : > { %362 = vst [vmem:[%s1306_s20 + $0x8] sm:$0xff] %v358_v35  ;;  %v390_v38 = vadd.f32 %v386_v34, %v358_v35  ;;  %v664_v39 = vpack.c.bf16 %v358_v35, %v357_v27  ;;  %s914_s20 = sshll.u32 %s1082_s22, 4  ;;  %s915_s20 = int_to_ptr.vmem [resolvable:$false] %s914_s20 }
 0x142   : > { %396 = vst [vmem:[%s1310_s1 + $0x18] sm:$0xff] %v392_v36  ;;  %671 = vst [vmem:[%s1308_s0 + $0x8] sm:$0xff] %v669_v37   ;;  %s916_s3 = scalar_lea.vmem %s915_s20, 1024  ;;  %p917_p12 = scmp.lt.s32.totalorder %s1352_s13, %s915_s20 }
 0x143   : > { %p918_p1 = scmp.lt.s32.totalorder %s916_s3, %s910_s29 }
 0x145   : > { %p919_p10 = por %p918_p1, %p917_p12 }
 0x147   : > { %p920_p13 = pnand %p919_p10, %p913_p0 }
 0x149   : > { %923 = shalt.err (!%p920_p13)
}
 0x14a   : > { %s924_s9 = scalar_lea.hbm %s1348_s25, 512  ;;  %s928_s22 = scalar_lea.hbm %s1467_s6, 2048 }
 0x14b   : > { %p925_p2 = scmp.ne.s32.totalorder %s1348_s25, %s924_s9  ;;  %p929_p7 = scmp.lt.s32.totalorder %s1348_s25, %s1467_s6 }
 0x14c   : > { %p930_p8 = scmp.lt.s32.totalorder %s928_s22, %s924_s9 }
 0x14d   : > { %p926_p9 = pnand %p925_p2, %p1497_p6 }
 0x14e   : > { %p931_p4 = por %p930_p8, %p929_p7 }
 0x14f   : > { %p927_p3 = pneg %p926_p9 }
 0x151   : > { %p932_p5 = pnand %p931_p4, %p927_p3 }
 0x153   : > { %935 = shalt.err (!%p932_p5)
}
 0x154   : > { %s1083_s3 = smov 128   ;;  %s1084_s29 = smov 8   ;;  %394 = vst [vmem:[%s1310_s1 + $0x8] sm:$0xff] %v390_v38  ;;  %665 = vst [vmem:[%s1308_s0] sm:$0xff] %v664_v39  }
 0x155   : > { %s1498_s4 = scalar_lea.sflag [#allocation8], %s1293_s15  ;;  %s1499_s23 = sand.u32 1, %s1164_s19  }
 0x156   : > { %682 = dma.vmem_to_hbm [thread:$0]  (%p1497_p6), %s1352_s13, 512, %s1348_s25, %s1498_s4, %s1083_s3, %s1083_s3, %s1084_s29  }
 0x157   : > { %s1397_s20 = scalar_lea.sflag [#allocation14], %s1499_s23  ;;  %s936_s9 = scalar_lea.vmem %s1341_s11, 256 }
 0x158   : > { %p937_p11 = scmp.ne.s32.totalorder %s1341_s11, %s936_s9  ;;  %s1085_s14 = smov [#allocation13]  }
 0x159   : > { %s940_s10 = sshll.u32 %s1085_s14, 4  ;;  %s941_s10 = int_to_ptr.vmem [resolvable:$false] %s940_s10 }
 0x15a   : > { %p938_p0 = pnand %p937_p11, %p1497_p6  ;;  %s942_s22 = scalar_lea.vmem %s941_s10, 512 }
 0x15b   : > { %p943_p1 = scmp.lt.s32.totalorder %s1341_s11, %s941_s10  ;;  %p944_p10 = scmp.lt.s32.totalorder %s942_s22, %s936_s9 }
 0x15c   : > { %p939_p12 = pneg %p938_p0 }
 0x15d   : > { %p945_p13 = por %p944_p10, %p943_p1 }
 0x15f   : > { %p946_p2 = pnand %p945_p13, %p939_p12 }
 0x161   : > { %949 = shalt.err (!%p946_p2)
}
 0x162   : > { %s950_s19 = scalar_lea.hbm %s1339_s30, 256  ;;  %s954_s1 = scalar_lea.hbm %s1468_s7, 1024 }
 0x163   : > { %p951_p9 = scmp.ne.s32.totalorder %s1339_s30, %s950_s19  ;;  %p955_p8 = scmp.lt.s32.totalorder %s1339_s30, %s1468_s7 }
 0x164   : > { %p956_p4 = scmp.lt.s32.totalorder %s954_s1, %s950_s19 }
 0x165   : > { %p952_p3 = pnand %p951_p9, %p1497_p6 }
 0x166   : > { %p957_p5 = por %p956_p4, %p955_p8 }
 0x167   : > { %p953_p7 = pneg %p952_p3 }
 0x169   : > { %p958_p11 = pnand %p957_p5, %p953_p7 }
 0x16b   : > { %961 = shalt.err (!%p958_p11)
}
 0x16c   : > { %s1086_s4 = smov 64   ;;  %s1087_s23 = smov 4  }
 0x16d   : > { %683 = dma.vmem_to_hbm [thread:$0]  (%p1497_p6), %s1341_s11, 256, %s1339_s30, %s1397_s20, %s1086_s4, %s1086_s4, %s1087_s23  }
 0x16e   : > { %s962_s9 = scalar_lea.vmem %s1363_s26, 512  ;;  %s1088_s14 = smov [#allocation15]  }
 0x16f   : > { %p963_p0 = scmp.ne.s32.totalorder %s1363_s26, %s962_s9  ;;  %s966_s10 = sshll.u32 %s1088_s14, 4  ;;  %s967_s10 = int_to_ptr.vmem [resolvable:$false] %s966_s10 }
 0x170   : > { %s968_s22 = scalar_lea.vmem %s967_s10, 1024  ;;  %p969_p10 = scmp.lt.s32.totalorder %s1363_s26, %s967_s10 }
 0x171   : > { %p964_p12 = pnand %p963_p0, %p1497_p6  ;;  %p970_p13 = scmp.lt.s32.totalorder %s968_s22, %s962_s9 }
 0x173   : > { %p965_p1 = pneg %p964_p12  ;;  %p971_p2 = por %p970_p13, %p969_p10 }
 0x175   : > { %p972_p9 = pnand %p971_p2, %p965_p1 }
 0x177   : > { %975 = shalt.err (!%p972_p9)
}
 0x178   : > { %s976_s19 = scalar_lea.hbm %s1361_s12, 512  ;;  %s980_s15 = scalar_lea.hbm %s1469_s8, 2048 }
 0x179   : > { %p977_p3 = scmp.ne.s32.totalorder %s1361_s12, %s976_s19  ;;  %p981_p4 = scmp.lt.s32.totalorder %s1361_s12, %s1469_s8 }
 0x17a   : > { %p982_p5 = scmp.lt.s32.totalorder %s980_s15, %s976_s19 }
 0x17b   : > { %p978_p7 = pnand %p977_p3, %p1497_p6 }
 0x17c   : > { %p983_p11 = por %p982_p5, %p981_p4 }
 0x17d   : > { %p979_p8 = pneg %p978_p7 }
 0x17f   : > { %p984_p0 = pnand %p983_p11, %p979_p8 }
 0x181   : > { %987 = shalt.err (!%p984_p0)
}
 0x182   : > { %684 = dma.vmem_to_hbm [thread:$0]  (%p1497_p6), %s1363_s26, 512, %s1361_s12, %s1397_s20, %s1083_s3, %s1083_s3, %s1084_s29  }
 0x183 PF: > { %p714_p12 = scmp.ge.s32.totalorder %s1056_s18, 2  ;;  %s468_s13 = sand.u32 1, %s1044_s2  }
 0x184   : > { %p1500_p1 = scmp.ne.s32.totalorder %s1484_s28, 0  ;;  %s469_s25 = scalar_lea.sflag [#allocation8], %s468_s13 }
 0x186   : > { %p700_p10 = pnand %p714_p12, %p1500_p1 }
 0x188   : > { %p701_p13 = pneg %p700_p10 }
 0x18a   : > { %1035 = dma.done.wait (%p701_p13), %s469_s25, 512  }
 0x18b   : > { %1037 = vsyncadd (%p701_p13), %s469_s25, 4294966784  ;;  %s1501_s27 = sadd.s32 4294967294, %s1056_s18  }
 0x18c   : > { %s477_s4 = sand.u32 1, %s1501_s27  }
 0x18d   : > { %s478_s23 = scalar_lea.sflag [#allocation14], %s477_s4 }
 0x18e   : > { %1039 = dma.done.wait (%p701_p13), %s478_s23, 768  }
 0x18f   : > { %1041 = vsyncadd (%p701_p13), %s478_s23, 4294966528  ;;  %p36_p6 = scmp.ge.s32.totalorder %s1168_s21, 6   ;;  %s1502_s2 = smov %s1048_s16 }
 0x190   : > { %s1503_s16 = smov %s1052_s17  ;;  %s1504_s17 = smov %s1180_s24 }
 0x191   : > { %s1505_s18 = smov %s1168_s21  ;;  %38 = sbr.rel (!%p36_p6) target bundleno = 34 (0x22), region = 155 }
 0x196   :  { %492 = vsyncpa [#allocation7], 1 }
 0x197   :  { %494 = vsyncpa [#allocation7 + $0x1], 1 }
 0x198   :  { %495 = vsyncpa [#allocation10], 1 }
 0x199   :  { %496 = vsyncpa [#allocation8], 1 }
 0x19a   :  { %498 = vsyncpa [#allocation8 + $0x1], 1 }
 0x19b   :  { %499 = vsyncpa [#allocation14], 1 }
 0x19c   :  { %501 = vsyncpa [#allocation14 + $0x1], 1 }

</bundles_post_ra>
